<compile_context>
chip_gen: v7x
topology: tpu7x:2x2x1
jax: 0.10.0
libtpu: 0.0.40
codegen_flags: <defaults>
</compile_context>

<pallas_src>
import jax
import jax.numpy as jnp
from jax.experimental import pallas as pl
from jax.experimental.pallas import tpu as pltpu

LANE = 128


def _round_up(x, m):
    return (x + m - 1) // m * m


def _cdiv(a, b):
    return -(-a // b)


# ----------------------------- Pallas kernel ------------------------------ #
def range_action_kernel(obs_ref, side_ref,
                        w_obs_ref, emb_tab_ref,
                        w1_ref, b1_ref, w2_ref, b2_ref,
                        out_ref):
    tb = obs_ref.shape[0]
    n_ranges = emb_tab_ref.shape[0]
    a_pad = out_ref.shape[1]

    obs = obs_ref[...]                                      # (TB, obs) bf16
    side = side_ref[...]                                    # (TB, 2) int32
    idx = side[:, 0:1]                                      # (TB, 1) range idx
    mword = side[:, 1:2]                                    # (TB, 1) legal bitmask

    # ---- MPM layer: obs @ W_obs + (range_emb @ W_emb + b_mpm)[idx], ReLU ---
    h = jnp.dot(obs, w_obs_ref[...], preferred_element_type=jnp.float32)
    # Fused range-embedding gather via one-hot matmul (exact row select;
    # b_mpm is pre-folded into emb_tab).  OOB/negative idx -> zero row.
    range_lanes = jax.lax.broadcasted_iota(jnp.int32, (tb, n_ranges), 1)
    onehot = (range_lanes == idx).astype(jnp.bfloat16)
    h = h + jnp.dot(onehot, emb_tab_ref[...],
                    preferred_element_type=jnp.float32)
    h = jnp.maximum(h, 0.0)                                 # f32

    # ---- final_layer + ReLU ------------------------------------------------
    h = jnp.dot(h.astype(jnp.bfloat16), w1_ref[...],
                preferred_element_type=jnp.float32) + b1_ref[...]
    h = jnp.maximum(h, 0.0)

    # ---- out_layer + legal-action masking (lane-dense 128-wide bf16 store) -
    o = jnp.dot(h.astype(jnp.bfloat16), w2_ref[...],
                preferred_element_type=jnp.float32) + b2_ref[...]
    lane = jax.lax.broadcasted_iota(jnp.int32, (tb, a_pad), 1)
    bits = (mword >> jnp.minimum(lane, 31)) & 1             # per-lane bit decode
    keep = (bits != 0) & (lane < 32)
    out_ref[...] = jnp.where(keep, o, jnp.float32(-1e21)).astype(out_ref.dtype)


# ------------------------------- wrapper ---------------------------------- #
def _pad_rows(a, rows):
    if a.shape[0] == rows:
        return a
    pad = ((0, rows - a.shape[0]),) + ((0, 0),) * (a.ndim - 1)
    return jnp.pad(a, pad)


def range_action_net(prep, pub_obses, range_idxs, legal_action_masks,
                     *, block_rows=1024):
    """Returns (B, n_actions) masked f32 logits (softmax NOT applied)."""
    B, obs_dim = pub_obses.shape
    n_actions = prep["n_actions"]
    a_pad = prep["w2"].shape[1]
    h0p = prep["w_obs"].shape[1]
    h1p = prep["w1"].shape[1]
    n_ranges = prep["emb_tab"].shape[0]
    assert n_actions <= 32, "bitmask mask path assumes n_actions <= 32"

    # --- batch tiling: pad only to the tile, guarantee >=2 grid steps -------
    B32 = _round_up(B, 32)                 # 32 covers bf16 (16) / int32 (8) sublanes
    nb = max(1, _cdiv(B32, block_rows))
    if nb < 2 and B32 >= 64:
        nb = 2                             # give both v7x TensorCores work
    TB = _round_up(_cdiv(B32, nb), 32)
    B_pad = nb * TB

    obs = _pad_rows(pub_obses.astype(jnp.bfloat16), B_pad)

    # Pack range_idx + legal-action bitmask into one (B_pad, 2) int32 stream.
    bit_w = (jnp.int32(1) << jnp.arange(n_actions, dtype=jnp.int32))[None, :]
    mask_bits = jnp.where(legal_action_masks == 1, bit_w, 0).sum(
        axis=1).astype(jnp.int32)          # exact torch `mask == 1` semantics
    side = jnp.concatenate(
        [range_idxs.astype(jnp.int32)[:, None], mask_bits[:, None]], axis=1)
    side = _pad_rows(side, B_pad)          # padded rows: idx=0, mask=0 (all -1e21)

    weights = (prep["w_obs"], prep["emb_tab"],
               prep["w1"], prep["b1"], prep["w2"], prep["b2"])

    def batch_spec(arr):
        return pl.BlockSpec((TB,) + arr.shape[1:], lambda i: (i, 0))

    def const_spec(arr):
        return pl.BlockSpec(arr.shape, lambda i: (0, 0))

    flops = 2 * B_pad * (obs_dim * h0p + n_ranges * h0p + h0p * h1p
                         + h1p * a_pad)
    bytes_accessed = int(obs.size * 2 + side.size * 4
                         + sum(int(w.size) * w.dtype.itemsize for w in weights)
                         + B_pad * a_pad * 2)

    out = pl.pallas_call(
        range_action_kernel,
        out_shape=jax.ShapeDtypeStruct((B_pad, a_pad), jnp.bfloat16),
        grid=(nb,),
        in_specs=[batch_spec(obs), batch_spec(side)]
                 + [const_spec(w) for w in weights],
        out_specs=pl.BlockSpec((TB, a_pad), lambda i: (i, 0)),
        compiler_params=pltpu.CompilerParams(
            dimension_semantics=("parallel",)),
        cost_estimate=pl.CostEstimate(flops=flops, transcendentals=0,
                                      bytes_accessed=bytes_accessed),
    )(obs, side, *weights)

    return out[:B, :n_actions].astype(jnp.float32)


def forward(prep, pub_obses, range_idxs, legal_action_masks, *, block_rows=1024):
    """Equivalent of RangeActionNet.forward (mode='regular'); no softmax."""
    return range_action_net(prep, pub_obses, range_idxs, legal_action_masks,
                            block_rows=block_rows)


# --------------------------- parameter handling ---------------------------- #
def init_params(key, obs_dim, emb_dim, n_ranges, mpm_units, n_units_final,
                n_actions):
    ks = jax.random.split(key, 7)
    s = lambda k, shape, fan_in: (jax.random.normal(k, shape, jnp.float32)
                                  / jnp.sqrt(jnp.float32(fan_in)))
    d_in = obs_dim + emb_dim
    return {
        "range_emb": s(ks[0], (n_ranges, emb_dim), emb_dim),
        "w_mpm":   s(ks[1], (d_in, mpm_units), d_in),
        "b_mpm":   jnp.zeros((1, mpm_units), jnp.float32),
        "w_final": s(ks[2], (mpm_units, n_units_final), mpm_units),
        "b_final": s(ks[3], (1, n_units_final), n_units_final),
        "w_out":   s(ks[4], (n_units_final, n_actions), n_units_final),
        "b_out":   s(ks[5], (1, n_actions), n_actions),
    }


def prepare_params(params, *, obs_dim):
    """One-time split / pad / cast of params for the TPU kernel.

    W_mpm is split at obs_dim into W_obs and W_emb; range_emb @ W_emb + b_mpm
    is precomputed as a small (n_ranges, H) table so the per-sample embedding
    gather, concat AND the MPM bias add are fused into the kernel.  Feature
    dims are zero-padded to multiples of 128 (lane-dense MXU tiles and
    unmasked output stores); weights cast to bf16, remaining biases stay f32.
    """
    h0 = params["w_mpm"].shape[1]
    h1 = params["w_final"].shape[1]
    n_actions = params["w_out"].shape[1]
    h0p = _round_up(h0, LANE)
    h1p = _round_up(h1, LANE)
    ap = _round_up(n_actions, LANE)

    def pad2(a, rows, cols):
        return jnp.zeros((rows, cols), a.dtype).at[:a.shape[0], :a.shape[1]].set(a)

    w_obs = pad2(params["w_mpm"][:obs_dim], obs_dim, h0p)
    w_emb = params["w_mpm"][obs_dim:]                        # (emb_dim, h0)
    emb_tab = pad2(params["range_emb"] @ w_emb + params["b_mpm"],
                   params["range_emb"].shape[0], h0p)
    return {
        "n_actions": n_actions,
        "w_obs":   w_obs.astype(jnp.bfloat16),
        "emb_tab": emb_tab.astype(jnp.bfloat16),             # includes b_mpm
        "w1":      pad2(params["w_final"], h0p, h1p).astype(jnp.bfloat16),
        "b1":      pad2(params["b_final"], 1, h1p),
        "w2":      pad2(params["w_out"], h1p, ap).astype(jnp.bfloat16),
        "b2":      pad2(params["b_out"], 1, ap),
    }


# ----------------------------------- test ---------------------------------- #
if __name__ == "__main__":
    B = 32             # batch
    OBS_DIM = 24       # flat public-observation size
    EMB_DIM = 8        # range-index embedding size
    N_RANGES = 16      # vocabulary of range indices
    MPM_UNITS = 32     # self._mpm.output_units
    N_UNITS_FINAL = 32 # args.n_units_final
    N_ACTIONS = 8      # env_bldr.N_ACTIONS

    key = jax.random.PRNGKey(0)
    k_p, k_obs, k_idx, k_mask = jax.random.split(key, 4)

    params = init_params(k_p, OBS_DIM, EMB_DIM, N_RANGES,
                         MPM_UNITS, N_UNITS_FINAL, N_ACTIONS)
    prep = prepare_params(params, obs_dim=OBS_DIM)

    pub_obses = jax.random.normal(k_obs, (B, OBS_DIM), jnp.float32)
    range_idxs = jax.random.randint(k_idx, (B,), 0, N_RANGES)
    legal_action_masks = (jax.random.uniform(k_mask, (B, N_ACTIONS)) > 0.3
                          ).astype(jnp.float32)

    out = forward(prep, pub_obses, range_idxs, legal_action_masks)
    out = jax.block_until_ready(out)

    # Plain-JAX reference mirroring the kernel's bf16-weight / f32-accumulate
    # / bf16-output numerics (same math as torch: relu(mpm) -> relu(final)
    # -> out -> mask).
    f32 = jnp.float32
    obs_b = pub_obses.astype(jnp.bfloat16)
    emb_row = jnp.take(prep["emb_tab"], range_idxs, axis=0).astype(f32)
    h = jnp.dot(obs_b, prep["w_obs"], preferred_element_type=f32)
    h = jnp.maximum(h + emb_row, 0.0)
    h = jnp.dot(h.astype(jnp.bfloat16), prep["w1"],
                preferred_element_type=f32) + prep["b1"]
    h = jnp.maximum(h, 0.0)
    o = jnp.dot(h.astype(jnp.bfloat16), prep["w2"],
                preferred_element_type=f32) + prep["b2"]
    o = o[:, :N_ACTIONS]
    ref = jnp.where(legal_action_masks == 1, o, f32(-1e21))
    ref = ref.astype(jnp.bfloat16).astype(f32)   # kernel stores logits in bf16

    assert out.shape == (B, N_ACTIONS)
    assert jnp.allclose(out, ref, rtol=2e-2, atol=2e-2), "mismatch vs reference"

    print("KERNEL_OK")
</pallas_src>

<mosaic_0001>
module attributes {stable_mosaic.version = 11 : i64} {
  func.func @range_action_kernel(%arg0: i32, %arg1: memref<32x24xbf16, #tpu.memory_space<vmem>>, %arg2: memref<32x2xi32, #tpu.memory_space<vmem>>, %arg3: memref<24x128xbf16, #tpu.memory_space<vmem>>, %arg4: memref<16x128xbf16, #tpu.memory_space<vmem>>, %arg5: memref<128x128xbf16, #tpu.memory_space<vmem>>, %arg6: memref<1x128xf32, #tpu.memory_space<vmem>>, %arg7: memref<128x128xbf16, #tpu.memory_space<vmem>>, %arg8: memref<1x128xf32, #tpu.memory_space<vmem>>, %arg9: memref<32x128xbf16, #tpu.memory_space<vmem>>) attributes {dimension_semantics = [#tpu.dimension_semantics<parallel>], iteration_bounds = array<i64: 1>, scalar_prefetch = 0 : i64, scratch_operands = 0 : i64, tpu.core_type = #tpu.core_type<tc>, window_params = [{transform_indices = @transform_0, window_bounds = array<i64: 32, 24>}, {transform_indices = @transform_1, window_bounds = array<i64: 32, 2>}, {pipeline_mode = #tpu.pipeline_mode<synchronous>, transform_indices = @transform_2, window_bounds = array<i64: 24, 128>}, {pipeline_mode = #tpu.pipeline_mode<synchronous>, transform_indices = @transform_3, window_bounds = array<i64: 16, 128>}, {pipeline_mode = #tpu.pipeline_mode<synchronous>, transform_indices = @transform_4, window_bounds = array<i64: 128, 128>}, {pipeline_mode = #tpu.pipeline_mode<synchronous>, transform_indices = @transform_5, window_bounds = array<i64: 1, 128>}, {pipeline_mode = #tpu.pipeline_mode<synchronous>, transform_indices = @transform_6, window_bounds = array<i64: 128, 128>}, {pipeline_mode = #tpu.pipeline_mode<synchronous>, transform_indices = @transform_7, window_bounds = array<i64: 1, 128>}, {transform_indices = @transform_8, window_bounds = array<i64: 32, 128>}]} {
    %c0 = arith.constant 0 : index
    %c0_0 = arith.constant 0 : index
    %0 = vector.load %arg1[%c0, %c0_0] : memref<32x24xbf16, #tpu.memory_space<vmem>>, vector<32x24xbf16>
    %c0_1 = arith.constant 0 : index
    %c0_2 = arith.constant 0 : index
    %1 = vector.load %arg2[%c0_1, %c0_2] : memref<32x2xi32, #tpu.memory_space<vmem>>, vector<32x2xi32>
    %2 = vector.extract_strided_slice %1 {offsets = [0, 0], sizes = [32, 1], strides = [1, 1]} : vector<32x2xi32> to vector<32x1xi32>
    %3 = vector.extract_strided_slice %1 {offsets = [0, 1], sizes = [32, 1], strides = [1, 1]} : vector<32x2xi32> to vector<32x1xi32>
    %c0_3 = arith.constant 0 : index
    %c0_4 = arith.constant 0 : index
    %4 = vector.load %arg3[%c0_3, %c0_4] : memref<24x128xbf16, #tpu.memory_space<vmem>>, vector<24x128xbf16>
    %cst = arith.constant dense<0.000000e+00> : vector<32x128xf32>
    %5 = tpu.matmul %0, %4, %cst {dimension_numbers = #tpu.dot_dimension_numbers<[1], [0], [0], [1], [0, 0, 1, 1], [], []>} : vector<32x24xbf16>, vector<24x128xbf16>, vector<32x128xf32> -> vector<32x128xf32>
    %6 = tpu.iota {dimensions = array<i32: 1>} : vector<32x16xi32>
    %7 = vector.broadcast %2 : vector<32x1xi32> to vector<32x16xi32>
    %8 = arith.cmpi eq, %6, %7 : vector<32x16xi32>
    %9 = arith.extui %8 : vector<32x16xi1> to vector<32x16xi32>
    %10 = arith.sitofp %9 : vector<32x16xi32> to vector<32x16xf32>
    %11 = arith.truncf %10 : vector<32x16xf32> to vector<32x16xbf16>
    %c0_5 = arith.constant 0 : index
    %c0_6 = arith.constant 0 : index
    %12 = vector.load %arg4[%c0_5, %c0_6] : memref<16x128xbf16, #tpu.memory_space<vmem>>, vector<16x128xbf16>
    %cst_7 = arith.constant dense<0.000000e+00> : vector<32x128xf32>
    %13 = tpu.matmul %11, %12, %cst_7 {dimension_numbers = #tpu.dot_dimension_numbers<[1], [0], [0], [1], [0, 0, 1, 1], [], []>} : vector<32x16xbf16>, vector<16x128xbf16>, vector<32x128xf32> -> vector<32x128xf32>
    %14 = arith.addf %5, %13 : vector<32x128xf32>
    %cst_8 = arith.constant 0.000000e+00 : f32
    %15 = vector.broadcast %cst_8 : f32 to vector<32x128xf32>
    %16 = arith.maximumf %14, %15 : vector<32x128xf32>
    %17 = arith.truncf %16 : vector<32x128xf32> to vector<32x128xbf16>
    %c0_9 = arith.constant 0 : index
    %c0_10 = arith.constant 0 : index
    %18 = vector.load %arg5[%c0_9, %c0_10] : memref<128x128xbf16, #tpu.memory_space<vmem>>, vector<128x128xbf16>
    %cst_11 = arith.constant dense<0.000000e+00> : vector<32x128xf32>
    %19 = tpu.matmul %17, %18, %cst_11 {dimension_numbers = #tpu.dot_dimension_numbers<[1], [0], [0], [1], [0, 0, 1, 1], [], []>} : vector<32x128xbf16>, vector<128x128xbf16>, vector<32x128xf32> -> vector<32x128xf32>
    %c0_12 = arith.constant 0 : index
    %c0_13 = arith.constant 0 : index
    %20 = vector.load %arg6[%c0_12, %c0_13] : memref<1x128xf32, #tpu.memory_space<vmem>>, vector<1x128xf32>
    %21 = vector.broadcast %20 : vector<1x128xf32> to vector<32x128xf32>
    %22 = arith.addf %19, %21 : vector<32x128xf32>
    %cst_14 = arith.constant 0.000000e+00 : f32
    %23 = vector.broadcast %cst_14 : f32 to vector<32x128xf32>
    %24 = arith.maximumf %22, %23 : vector<32x128xf32>
    %25 = arith.truncf %24 : vector<32x128xf32> to vector<32x128xbf16>
    %c0_15 = arith.constant 0 : index
    %c0_16 = arith.constant 0 : index
    %26 = vector.load %arg7[%c0_15, %c0_16] : memref<128x128xbf16, #tpu.memory_space<vmem>>, vector<128x128xbf16>
    %cst_17 = arith.constant dense<0.000000e+00> : vector<32x128xf32>
    %27 = tpu.matmul %25, %26, %cst_17 {dimension_numbers = #tpu.dot_dimension_numbers<[1], [0], [0], [1], [0, 0, 1, 1], [], []>} : vector<32x128xbf16>, vector<128x128xbf16>, vector<32x128xf32> -> vector<32x128xf32>
    %c0_18 = arith.constant 0 : index
    %c0_19 = arith.constant 0 : index
    %28 = vector.load %arg8[%c0_18, %c0_19] : memref<1x128xf32, #tpu.memory_space<vmem>>, vector<1x128xf32>
    %29 = vector.broadcast %28 : vector<1x128xf32> to vector<32x128xf32>
    %30 = arith.addf %27, %29 : vector<32x128xf32>
    %31 = tpu.iota {dimensions = array<i32: 1>} : vector<32x128xi32>
    %c31_i32 = arith.constant 31 : i32
    %32 = vector.broadcast %c31_i32 : i32 to vector<32x128xi32>
    %33 = arith.minsi %31, %32 : vector<32x128xi32>
    %34 = vector.broadcast %3 : vector<32x1xi32> to vector<32x128xi32>
    %35 = arith.shrsi %34, %33 : vector<32x128xi32>
    %c1_i32 = arith.constant 1 : i32
    %36 = vector.broadcast %c1_i32 : i32 to vector<32x128xi32>
    %37 = arith.andi %35, %36 : vector<32x128xi32>
    %c0_i32 = arith.constant 0 : i32
    %38 = vector.broadcast %c0_i32 : i32 to vector<32x128xi32>
    %39 = arith.cmpi ne, %37, %38 : vector<32x128xi32>
    %c32_i32 = arith.constant 32 : i32
    %40 = vector.broadcast %c32_i32 : i32 to vector<32x128xi32>
    %41 = arith.cmpi slt, %31, %40 : vector<32x128xi32>
    %42 = arith.andi %39, %41 : vector<32x128xi1>
    %cst_20 = arith.constant -1.000000e+21 : f32
    %43 = vector.broadcast %cst_20 : f32 to vector<32x128xf32>
    %44 = arith.select %42, %30, %43 : vector<32x128xi1>, vector<32x128xf32>
    %45 = arith.truncf %44 : vector<32x128xf32> to vector<32x128xbf16>
    %c0_21 = arith.constant 0 : index
    %c0_22 = arith.constant 0 : index
    %46 = vector.load %arg9[%c0_21, %c0_22] : memref<32x128xbf16, #tpu.memory_space<vmem>>, vector<32x128xbf16>
    tpu.vector_store %arg9[%c0_21, %c0_22], %45 {strides = array<i32>} : memref<32x128xbf16, #tpu.memory_space<vmem>>, vector<32x128xbf16>,
    return
  }
  func.func @transform_0(%arg0: i32) -> (i32, i32) {
    %c0_i32 = arith.constant 0 : i32
    %c0_i32_0 = arith.constant 0 : i32
    return %arg0, %c0_i32 : i32, i32
  }
  func.func @transform_1(%arg0: i32) -> (i32, i32) {
    %c0_i32 = arith.constant 0 : i32
    %c0_i32_0 = arith.constant 0 : i32
    return %arg0, %c0_i32 : i32, i32
  }
  func.func @transform_2(%arg0: i32) -> (i32, i32) {
    %c0_i32 = arith.constant 0 : i32
    %c0_i32_0 = arith.constant 0 : i32
    %c0_i32_1 = arith.constant 0 : i32
    return %c0_i32, %c0_i32_0 : i32, i32
  }
  func.func @transform_3(%arg0: i32) -> (i32, i32) {
    %c0_i32 = arith.constant 0 : i32
    %c0_i32_0 = arith.constant 0 : i32
    %c0_i32_1 = arith.constant 0 : i32
    return %c0_i32, %c0_i32_0 : i32, i32
  }
  func.func @transform_4(%arg0: i32) -> (i32, i32) {
    %c0_i32 = arith.constant 0 : i32
    %c0_i32_0 = arith.constant 0 : i32
    %c0_i32_1 = arith.constant 0 : i32
    return %c0_i32, %c0_i32_0 : i32, i32
  }
  func.func @transform_5(%arg0: i32) -> (i32, i32) {
    %c0_i32 = arith.constant 0 : i32
    %c0_i32_0 = arith.constant 0 : i32
    %c0_i32_1 = arith.constant 0 : i32
    return %c0_i32, %c0_i32_0 : i32, i32
  }
  func.func @transform_6(%arg0: i32) -> (i32, i32) {
    %c0_i32 = arith.constant 0 : i32
    %c0_i32_0 = arith.constant 0 : i32
    %c0_i32_1 = arith.constant 0 : i32
    return %c0_i32, %c0_i32_0 : i32, i32
  }
  func.func @transform_7(%arg0: i32) -> (i32, i32) {
    %c0_i32 = arith.constant 0 : i32
    %c0_i32_0 = arith.constant 0 : i32
    %c0_i32_1 = arith.constant 0 : i32
    return %c0_i32, %c0_i32_0 : i32, i32
  }
  func.func @transform_8(%arg0: i32) -> (i32, i32) {
    %c0_i32 = arith.constant 0 : i32
    %c0_i32_0 = arith.constant 0 : i32
    return %arg0, %c0_i32 : i32, i32
  }
}

</mosaic_0001>

<bundles_post_ra>
// kernel: tpu_custom_call.1
= control target key start
LH: loop header
LB: loop body
LE: loop exit
PB: predicated region body
PF: predicated region fallthrough
CT: control target
= control target key end

     0   :  { %13 = vsyncpa [#allocation3], 0  ;;  %s992_s0 = inlined_call_operand.vmem [shape: bf16[32,24], index: 0, kind: input, shape index: {}]   ;;  %s993_s1 = inlined_call_operand.vmem [shape: s32[32,2], index: 1, kind: input, shape index: {}]   ;;  %s994_s2 = inlined_call_operand.vmem [shape: bf16[24,128], index: 2, kind: input, shape index: {}]   ;;  %s995_s3 = inlined_call_operand.hbm [shape: bf16[16,128], index: 3, kind: input, shape index: {}]   ;;  %s996_s4 = inlined_call_operand.vmem [shape: bf16[128,128], index: 4, kind: input, shape index: {}]   ;;  %s997_s5 = inlined_call_operand.vmem [shape: f32[1,128], index: 5, kind: input, shape index: {}]   ;;  %s998_s6 = inlined_call_operand.hbm [shape: bf16[128,128], index: 6, kind: input, shape index: {}]   ;;  %s999_s7 = inlined_call_operand.vmem [shape: f32[1,128], index: 7, kind: input, shape index: {}]   ;;  %s1000_s8 = inlined_call_operand.hbm [shape: bf16[32,128], index: 8, kind: output, shape index: {}]  }
   0x1   :  { %14 = vsyncpa [#allocation6], 0 }
   0x2   :  { %15 = vsyncpa [#allocation4], 0  ;;  %s807_s27 = smov [#allocation2]   ;;  %s735_s9 = scalar_lea.hbm %s995_s3, 128 }
   0x3   :  { %s27_s28 = sshll.u32 %s807_s27, 4  ;;  %p736_p0 = scmp.ne.s32.totalorder %s995_s3, %s735_s9  ;;  %s28_s28 = int_to_ptr.vmem [resolvable:$true] %s27_s28 }
   0x4   :  { %p739_p1 = scmp.lt.u32.totalorder %s735_s9, %s995_s3 }
   0x6   :  { %p741_p2 = pnand %p739_p1, %p736_p0 }
   0x8   :  { %744 = shalt.err (!%p741_p2)
}
   0x9   :  { %s745_s14 = scalar_lea.vmem %s28_s28, 128  ;;  %p750_p4 = scmp.lt.s32.totalorder %s28_s28, %s28_s28 }
   0xa   :  { %p746_p3 = scmp.ne.s32.totalorder %s28_s28, %s745_s14  ;;  %p751_p5 = scmp.lt.s32.totalorder %s745_s14, %s745_s14 }
   0xc   :  { %p752_p6 = por %p751_p5, %p750_p4 }
   0xe   :  { %p753_p7 = pnand %p752_p6, %p746_p3 }
  0x10   :  { %756 = shalt.err (!%p753_p7)
}
  0x11   :  { %s808_s15 = smov 64   ;;  %s809_s16 = smov 4  }
  0x12   :  { %33 = dma.hbm_to_vmem [thread:$0]  %s995_s3, 128, %s28_s28, [#allocation3], %s808_s15, %s808_s15, %s809_s16  }
  0x13   :  { %s810_s19 = smov [#allocation5]   ;;  %s757_s23 = scalar_lea.hbm %s998_s6, 1024 }
  0x14   :  { %s43_s20 = sshll.u32 %s810_s19, 4  ;;  %p758_p8 = scmp.ne.s32.totalorder %s998_s6, %s757_s23  ;;  %s44_s20 = int_to_ptr.vmem [resolvable:$true] %s43_s20 }
  0x15   :  { %p761_p9 = scmp.lt.u32.totalorder %s757_s23, %s998_s6 }
  0x17   :  { %p763_p10 = pnand %p761_p9, %p758_p8 }
  0x19   :  { %766 = shalt.err (!%p763_p10)
}
  0x1a   :  { %s767_s29 = scalar_lea.vmem %s44_s20, 1024  ;;  %p772_p12 = scmp.lt.s32.totalorder %s44_s20, %s44_s20 }
  0x1b   :  { %p768_p11 = scmp.ne.s32.totalorder %s44_s20, %s767_s29  ;;  %p773_p13 = scmp.lt.s32.totalorder %s767_s29, %s767_s29 }
  0x1d   :  { %p774_p0 = por %p773_p13, %p772_p12 }
  0x1f   :  { %p775_p1 = pnand %p774_p0, %p768_p11 }
  0x21   :  { %778 = shalt.err (!%p775_p1)
}
  0x22   :  { %49 = dma.hbm_to_vmem [thread:$0]  %s998_s6, 1024, %s44_s20, [#allocation6], %s808_s15, %s808_s15, %s809_s16  }
  0x23   :  { %801 = dma.done.wait [#allocation3], 128  }
  0x24   :  { %802 = vsyncadd [#allocation3], 4294967168 }
  0x25   :  { %803 = dma.done.wait [#allocation6], 1024  }
  0x26   :  { %804 = vsyncadd [#allocation6], 4294966272  ;;  %v811_v0 = vmov 0   ;;  %v893_v1 = vld [vmem:[%s993_s1 + $0x10] sm:$0xff]  ;;  %v898_v2 = vld [vmem:[%s993_s1] sm:$0xff]  ;;  %vm188_vm0 = vcmask 1043456   ;;  %v70_v12 = vlaneseq }
  0x27   :  { %711 = vset.pattern.permute.xlu1 %v811_v0  ;;  %710 = vset.pattern.permute.xlu0 %v811_v0  ;;  %v903_v3 = vld [vmem:[%s993_s1 + $0x18] sm:$0xff]  ;;  %v910_v4 = vld [vmem:[%s993_s1 + $0x8] sm:$0xff]  ;;  %v714_v5 = vld [vmem:[%s994_s2] sm:$0xff]   ;;  %vm181_vm1 = vcmask 195584   ;;  %vm106_vm6 = vcmask 130048   ;;  %v812_v18 = vmov 0.0  }
  0x28   :  { %79 = vperm.xlu1 %711, %v893_v1   ;;  %73 = vperm.xlu0 %710, %v898_v2   ;;  %v715_v6 = vld [vmem:[%s994_s2 + $0x8] ss:$0 sps:$4 sm:$0xff]   ;;  %v716_v7 = vld [vmem:[#allocation2] sm:$0xff]   ;;  %v929_v13 = vand.u32 127, %v70_v12  ;;  %v721_v26 = vld [vmem:[%s996_s4 + $0x10] sm:$0xff]   ;;  %v813_v58 = vmov 1  }
  0x29   :  { %649 = vmatprep.subr.bf16.mxu0 %v714_v5  ;;  %v717_v8 = vld [vmem:[%s992_s0] sm:$0xff]   ;;  %643 = vmatprep.subr.bf16.mxu1 %v716_v7  ;;  %v190_v9 = vsel %vm188_vm0, %v715_v6, 0  ;;  %v718_v10 = vld [vmem:[%s992_s0 + $0x8] sm:$0xff]   ;;  %v722_v27 = vld [vmem:[%s996_s4 + $0x18] sm:$0xff]  }
  0x2a   :  { %650 = vmatpush3.bf16.msra.mxu0 %v714_v5  ;;  %653 = vmatprep.mubr.msk.bf16.mxu0 %vm181_vm1, %v717_v8  ;;  %v719_v11 = vld [vmem:[%s996_s4] sm:$0xff]   ;;  %v720_v25 = vld [vmem:[%s996_s4 + $0x8] sm:$0xff]   ;;  %v725_v30 = vld [vmem:[%s996_s4 + $0x30] sm:$0xff]   ;;  %vm493_vm7 = vcmp.lt.s32.totalorder %v929_v13, 31  ;;  %vm519_vm8 = vcmp.lt.s32.totalorder %v929_v13, 32 }
  0x2b   :  { %701 = vmatprep.subr.msk.bf16.mxu0 %vm188_vm0, %v715_v6  ;;  %644 = vmatpush3.bf16.msra.mxu1 %v716_v7  ;;  %v723_v28 = vld [vmem:[%s996_s4 + $0x20] sm:$0xff]   ;;  %v724_v29 = vld [vmem:[%s996_s4 + $0x28] sm:$0xff]   ;;  %v726_v34 = vld [vmem:[%s996_s4 + $0x38] sm:$0xff]   ;;  %v494_v12 = vsel %vm493_vm7, %v929_v13, 31 }
  0x2c   :  { %82 = vperm.xlu1 %711, %v903_v3   ;;  %76 = vperm.xlu0 %710, %v910_v4   ;;  %v727_v36 = vld [vmem:[#allocation5] sm:$0xff]   ;;  %v728_v37 = vld [vmem:[#allocation5 + $0x8] sm:$0xff]   ;;  %v729_v38 = vld [vmem:[#allocation5 + $0x10] sm:$0xff]  }
  0x2d   :  { %657 = vmatprep.subr.bf16.mxu1 %v719_v11  ;;  %v730_v39 = vld [vmem:[#allocation5 + $0x18] sm:$0xff]   ;;  %v731_v40 = vld [vmem:[#allocation5 + $0x20] sm:$0xff]   ;;  %v732_v41 = vld [vmem:[#allocation5 + $0x28] sm:$0xff]  }
  0x2e   :  { %652 = vmatpush3.bf16.msra.mxu0 %v190_v9  ;;  %v733_v56 = vld [vmem:[#allocation5 + $0x30] sm:$0xff]   ;;  %v734_v57 = vld [vmem:[#allocation5 + $0x38] sm:$0xff]  }
  0x2f   :  { %677 = vmatprep.subr.bf16.mxu0 %v727_v36  ;;  %v579_v59 = vld [vmem:[%s997_s5] ss:$0 sm:$0xff] }
  0x30   :  { %713 = vset.pattern.permute.xlu1 %v813_v58  ;;  %712 = vset.pattern.permute.xlu0 %v813_v58 }
  0x31   :  { %654 = vmatmul.mubr.msk.bf16.vlgmr.msra.gmra.mrb[0].mxu0 %vm181_vm1, %v718_v10  ;;  %499 = vperm.xlu1 %713, %v910_v4  }
  0x32   :  { %678 = vmatpush3.bf16.msra.mxu0 %v727_v36  ;;  %496 = vperm.xlu0 %712, %v898_v2  }
  0x33   :  { %679 = vmatprep.subr.bf16.mxu0 %v728_v37 }
  0x35   :  { %502 = vperm.xlu1 %713, %v893_v1  }
  0x36   :  { %680 = vmatpush3.bf16.msra.mxu0 %v728_v37  ;;  %505 = vperm.xlu0 %712, %v903_v3  }
  0x37   :  { %681 = vmatprep.subr.bf16.mxu0 %v729_v38 }
  0x3a   :  { %682 = vmatpush3.bf16.msra.mxu0 %v729_v38 }
  0x3b   :  { %683 = vmatprep.subr.bf16.mxu0 %v730_v39 }
  0x3e   :  { %684 = vmatpush3.bf16.msra.mxu0 %v730_v39 }
  0x3f   :  { %685 = vmatprep.subr.bf16.mxu0 %v731_v40 }
  0x42   :  { %686 = vmatpush3.bf16.msra.mxu0 %v731_v40 }
  0x43   :  { %687 = vmatprep.subr.bf16.mxu0 %v732_v41 }
  0x46   :  { %688 = vmatpush3.bf16.msra.mxu0 %v732_v41 }
  0x47   :  { %689 = vmatprep.subr.bf16.mxu0 %v733_v56 }
  0x4a   :  { %690 = vmatpush3.bf16.msra.mxu0 %v733_v56 }
  0x4b   :  { %691 = vmatprep.subr.bf16.mxu0 %v734_v57 }
  0x4e   :  { %692 = vmatpush3.bf16.msra.mxu0 %v734_v57 }
  0xa7   :  { %v80_v14 = vpop.permute.xlu1 %79  ;;  %v74_v15 = vpop.permute.xlu0 %73 }
  0xa8   :  { %vm86_vm2 = vcmp.eq.s32.totalorder %v929_v13, %v80_v14  ;;  %vm84_vm3 = vcmp.eq.s32.totalorder %v929_v13, %v74_v15 }
  0xa9   :  { %v568_v19 = vsel %vm86_vm2, 1.0, %v812_v18  ;;  %v566_v20 = vsel %vm84_vm3, 1.0, %v812_v18 }
  0xab   :  { %v83_v16 = vpop.permute.xlu1 %82  ;;  %v77_v17 = vpop.permute.xlu0 %76 }
  0xac   :  { %vm87_vm4 = vcmp.eq.s32.totalorder %v929_v13, %v83_v16  ;;  %vm85_vm5 = vcmp.eq.s32.totalorder %v929_v13, %v77_v17 }
  0xad   :  { %v569_v21 = vsel %vm87_vm4, 1.0, %v812_v18  ;;  %v567_v22 = vsel %vm85_vm5, 1.0, %v812_v18 }
  0xae   :  { %v97_v23 = vpack.c.bf16 %v569_v21, %v568_v19  ;;  %v96_v24 = vpack.c.bf16 %v567_v22, %v566_v20 }
  0xb0   :  { %645 = vmatprep.mubr.msk.bf16.mxu1 %vm106_vm6, %v96_v24  ;;  %v500_v3 = vpop.permute.xlu1 %499  ;;  %v588_v24 = vld [vmem:[%s999_s7] ss:$0 sm:$0xff]  ;;  %s814_s7 = smov [#allocation7]  }
  0xb1   :  { %646 = vmatmul.mubr.msk.bf16.vlgmr.msra.gmra.mrb[0].mxu1 %vm106_vm6, %v97_v23  ;;  %v508_v17 = vshra.s32 %v500_v3, %v494_v12  ;;  %s553_s18 = sshll.u32 %s814_s7, 4  ;;  %s554_s18 = int_to_ptr.vmem [resolvable:$true] %s553_s18 }
  0xb2   :  { %658 = vmatpush3.bf16.msra.mxu1 %v719_v11  ;;  %v497_v11 = vpop.permute.xlu0 %496  ;;  %s779_s19 = scalar_lea.vmem %s554_s18, 256  ;;  %p784_p3 = scmp.lt.s32.totalorder %s554_s18, %s554_s18 }
  0xb3   :  { %659 = vmatprep.subr.bf16.mxu1 %v720_v25  ;;  %v507_v19 = vshra.s32 %v497_v11, %v494_v12  ;;  %v512_v21 = vand.u32 1, %v508_v17  ;;  %p780_p2 = scmp.ne.s32.totalorder %s554_s18, %s779_s19  ;;  %p785_p4 = scmp.lt.s32.totalorder %s779_s19, %s779_s19 }
  0xb4   :  { %v503_v14 = vpop.permute.xlu1 %502 }
  0xb5   :  { %v509_v16 = vshra.s32 %v503_v14, %v494_v12  ;;  %v511_v23 = vand.u32 1, %v507_v19  ;;  %vm516_vm10 = vcmp.ne.s32.totalorder %v512_v21, 0  ;;  %p786_p5 = por %p785_p4, %p784_p3 }
  0xb6   :  { %660 = vmatpush3.bf16.msra.mxu1 %v720_v25  ;;  %v506_v15 = vpop.permute.xlu0 %505  ;;  %vm521_vm14 = vmand %vm516_vm10, %vm519_vm8 }
  0xb7   :  { %661 = vmatprep.subr.bf16.mxu1 %v721_v26  ;;  %v510_v18 = vshra.s32 %v506_v15, %v494_v12  ;;  %v513_v20 = vand.u32 1, %v509_v16  ;;  %vm515_vm12 = vcmp.ne.s32.totalorder %v511_v23, 0  ;;  %p787_p6 = pnand %p786_p5, %p780_p2 }
  0xb8   :  { %vm520_vm0 = vmand %vm515_vm12, %vm519_vm8 }
  0xb9   :  { %v514_v22 = vand.u32 1, %v510_v18  ;;  %vm517_vm9 = vcmp.ne.s32.totalorder %v513_v20, 0 }
  0xba   :  { %662 = vmatpush3.bf16.msra.mxu1 %v721_v26  ;;  %vm522_vm13 = vmand %vm517_vm9, %vm519_vm8 }
  0xbb   :  { %663 = vmatprep.subr.bf16.mxu1 %v722_v27  ;;  %vm518_vm11 = vcmp.ne.s32.totalorder %v514_v22, 0 }
  0xbc   :  { %vm523_vm15 = vmand %vm518_vm11, %vm519_vm8 }
  0xbe   :  { %664 = vmatpush3.bf16.msra.mxu1 %v722_v27 }
  0xbf   :  { %665 = vmatprep.subr.bf16.mxu1 %v723_v28 }
  0xc2   :  { %666 = vmatpush3.bf16.msra.mxu1 %v723_v28 }
  0xc3   :  { %667 = vmatprep.subr.bf16.mxu1 %v724_v29 }
  0xc6   :  { %668 = vmatpush3.bf16.msra.mxu1 %v724_v29 }
  0xc7   :  { %669 = vmatprep.subr.bf16.mxu1 %v725_v30 }
  0xca   :  { %670 = vmatpush3.bf16.msra.mxu1 %v725_v30 }
  0xcb   :  { %671 = vmatprep.subr.bf16.mxu1 %v726_v34 }
  0xce   :  { %672 = vmatpush3.bf16.msra.mxu1 %v726_v34 }
 0x104   :  { %v655_v31 = vpop.f32.mrb[0].mxu0 }
 0x105   :  { %v226_v32 = vpop.f32.mrb[1].mxu0 }
 0x106   :  { %v656_v33 = vpop.f32.mrb[2].mxu0 }
 0x107   :  { %v229_v35 = vpop.f32.mrb[3].mxu0 }
 0x184   :  { %v647_v42 = vpop.f32.mrb[0].mxu1 }
 0x185   :  { %v235_v43 = vadd.f32 %v655_v31, %v647_v42  ;;  %v147_v44 = vpop.f32.mrb[1].mxu1 }
 0x186   :  { %v227_v45 = vadd.f32 %v226_v32, %v147_v44  ;;  %v648_v46 = vpop.f32.mrb[2].mxu1 }
 0x187   :  { %v238_v47 = vadd.f32 %v656_v33, %v648_v46  ;;  %v150_v48 = vpop.f32.mrb[3].mxu1  ;;  %v243_v50 = vmax.f32 %v235_v43, 0.0 }
 0x188   :  { %v230_v49 = vadd.f32 %v229_v35, %v150_v48  ;;  %v241_v52 = vmax.f32 %v227_v45, 0.0 }
 0x189   :  { %v244_v51 = vmax.f32 %v238_v47, 0.0 }
 0x18a   :  { %v242_v53 = vmax.f32 %v230_v49, 0.0 }
 0x18b   :  { %v246_v54 = vpack.c.bf16 %v244_v51, %v243_v50 }
 0x18c   :  { %v245_v55 = vpack.c.bf16 %v242_v53, %v241_v52 }
 0x18e   :  { %673 = vmatprep.mubr.bf16.mxu1 %v245_v55 }
 0x18f   :  { %674 = vmatmul.mubr.bf16.vlgmr.msra.gmra.mrb[4].mxu1 %v246_v54 }
 0x262   :  { %v675_v60 = vpop.f32.mrb[4].mxu1 }
 0x263   :  { %v361_v61 = vadd.f32 %v675_v60, %v579_v59  ;;  %v352_v62 = vpop.f32.mrb[5].mxu1 }
 0x264   :  { %v353_v63 = vadd.f32 %v579_v59, %v352_v62  ;;  %v676_v0 = vpop.f32.mrb[6].mxu1 }
 0x265   :  { %v364_v5 = vadd.f32 %v676_v0, %v579_v59  ;;  %v355_v6 = vpop.f32.mrb[7].mxu1  ;;  %v369_v8 = vmax.f32 %v361_v61, 0.0 }
 0x266   :  { %v356_v7 = vadd.f32 %v579_v59, %v355_v6  ;;  %v367_v9 = vmax.f32 %v353_v63, 0.0 }
 0x267   :  { %v370_v4 = vmax.f32 %v364_v5, 0.0 }
 0x268   :  { %v368_v2 = vmax.f32 %v356_v7, 0.0 }
 0x269   :  { %v372_v10 = vpack.c.bf16 %v370_v4, %v369_v8 }
 0x26a   :  { %v371_v1 = vpack.c.bf16 %v368_v2, %v367_v9 }
 0x26c   :  { %693 = vmatprep.mubr.bf16.mxu0 %v371_v1 }
 0x26d   :  { %694 = vmatmul.mubr.bf16.vlgmr.msra.gmra.mrb[4].mxu0 %v372_v10 }
 0x340   :  { %v695_v25 = vpop.f32.mrb[4].mxu0 }
 0x341   :  { %v487_v26 = vadd.f32 %v695_v25, %v588_v24  ;;  %v478_v27 = vpop.f32.mrb[5].mxu0 }
 0x342   :  { %v479_v28 = vadd.f32 %v588_v24, %v478_v27  ;;  %v696_v29 = vpop.f32.mrb[6].mxu0 }
 0x343   :  { %v490_v30 = vadd.f32 %v696_v29, %v588_v24  ;;  %v481_v31 = vpop.f32.mrb[7].mxu0  ;;  %v526_v33 = vsel %vm522_vm13, %v487_v26, -1e+21 }
 0x344   :  { %v482_v32 = vadd.f32 %v588_v24, %v481_v31  ;;  %v524_v35 = vsel %vm520_vm0, %v479_v28, -1e+21 }
 0x345   :  { %v527_v34 = vsel %vm523_vm15, %v490_v30, -1e+21 }
 0x346   :  { %v613_v36 = vpack.c.bf16 %v527_v34, %v526_v33  ;;  %v525_v37 = vsel %vm521_vm14, %v482_v32, -1e+21 }
 0x347   :  { %v608_v38 = vpack.c.bf16 %v525_v37, %v524_v35 }
 0x348   :  { %615 = vst [vmem:[#allocation7 + $0x8] sm:$0xff] %v613_v36  }
 0x349   :  { %609 = vst [vmem:[#allocation7] sm:$0xff] %v608_v38  }
 0x34a   :  { %790 = shalt.err (!%p787_p6)
}
 0x34b   :  { %s791_s22 = scalar_lea.hbm %s1000_s8, 256 }
 0x34c   :  { %p792_p7 = scmp.ne.s32.totalorder %s1000_s8, %s791_s22  ;;  %p795_p8 = scmp.lt.u32.totalorder %s791_s22, %s1000_s8 }
 0x34e   :  { %p797_p9 = pnand %p795_p8, %p792_p7 }
 0x350   :  { %800 = shalt.err (!%p797_p9)
}
 0x351   :  { %559 = dma.vmem_to_hbm [thread:$0]  %s554_s18, 256, %s1000_s8, [#allocation4], %s808_s15, %s808_s15, %s809_s16  }
 0x352   :  { %805 = dma.done.wait [#allocation4], 256  }
 0x353   :  { %806 = vsyncadd [#allocation4], 4294967040 }
 0x354   :  { %563 = vsyncpa [#allocation3], 1 }
 0x355   :  { %564 = vsyncpa [#allocation6], 1 }
 0x356   :  { %565 = vsyncpa [#allocation4], 1 }

</bundles_post_ra>
